<compile_context>
chip_gen: v5e
topology: v5e:2x2
jax: 0.10.0
libtpu: 0.0.40
codegen_flags: <defaults>
</compile_context>

<pallas_src>
import functools

import jax
import jax.numpy as jnp
from jax.experimental import pallas as pl
from jax.experimental.pallas import tpu as pltpu

EPS = 1e-5
MOMENTUM = 0.9

# Generation-safe budgets: keep the fused per-step working set <= ~24 MiB and the
# scoped VMEM limit at 32 MiB (v7x has only 64 MiB physical; v5e/v6e have 128 MiB).
FUSED_VMEM_BUDGET = 24 * 1024 * 1024
VMEM_LIMIT_BYTES = 32 * 1024 * 1024
TARGET_BLOCK_BYTES = 2 * 1024 * 1024   # two-pass fallback: ~2 MiB per X block


# --------------------------------------------------------------------------- #
# Kernels                                                                     #
# --------------------------------------------------------------------------- #
def _fused_kernel(x_ref, gamma_ref, beta_ref, mm_ref, mv_ref,
                  y_ref, new_mm_ref, new_mv_ref, *, inv_count):
    """Single pass: stats + normalize on a resident (N, c_tile, HW_pad) slab.

    Reads X once from HBM (via the BlockSpec pipeline) and writes Y once.
    """
    x = x_ref[...].astype(jnp.float32)                 # (n, c_tile, hw_pad)

    # Batch reduce first (pure VALU), then one lane reduce per channel (XLU).
    p = jnp.sum(x, axis=0)                             # (c_tile, hw_pad)
    p2 = jnp.sum(x * x, axis=0)
    s = jnp.sum(p, axis=1, keepdims=True)              # (c_tile, 1)
    sq = jnp.sum(p2, axis=1, keepdims=True)

    mean = s * inv_count
    var = jnp.maximum(sq * inv_count - mean * mean, 0.0)
    inv_std = jax.lax.rsqrt(var + EPS)                 # O(C) transcendental
    scale = gamma_ref[...] * inv_std                   # (c_tile, 1)
    shift = beta_ref[...] - mean * scale

    y_ref[...] = (x * scale[None, :, :] + shift[None, :, :]).astype(y_ref.dtype)
    new_mm_ref[...] = MOMENTUM * mm_ref[...] + (1.0 - MOMENTUM) * mean
    new_mv_ref[...] = MOMENTUM * mv_ref[...] + (1.0 - MOMENTUM) * var


def _stats_kernel(x_ref, gamma_ref, beta_ref, mm_ref, mv_ref,
                  scale_ref, shift_ref, new_mm_ref, new_mv_ref,
                  sum_acc, sumsq_acc, *, inv_count):
    """Two-pass fallback, pass 1: per-lane sum / sum-of-squares accumulation.

    x_ref:      (n_tile, c_tile, hw_tile) current tile
    gamma/beta/mm/mv_ref: (c_tile, 1) resident parameter tiles
    scale/shift/new_mm/new_mv_ref: (c_tile, 1) outputs (written in finalize)
    sum_acc/sumsq_acc: (c_tile, 128) f32 per-lane VMEM accumulators
    """
    ni = pl.program_id(1)
    mi = pl.program_id(2)

    @pl.when((ni == 0) & (mi == 0))
    def _init():
        sum_acc[...] = jnp.zeros_like(sum_acc)
        sumsq_acc[...] = jnp.zeros_like(sumsq_acc)

    x = x_ref[...].astype(jnp.float32)                 # (n_tile, c_tile, hw_tile)
    xb = jnp.sum(x, axis=0)                            # (c_tile, hw_tile), VALU
    xb2 = jnp.sum(x * x, axis=0)

    # Per-lane accumulation: fold 128-lane groups into the accumulator (VALU only,
    # static 128-aligned slices -> no relayout).  Cross-lane reduce deferred.
    acc_s = sum_acc[...]
    acc_q = sumsq_acc[...]
    for j in range(xb.shape[1] // 128):
        sl = slice(j * 128, (j + 1) * 128)
        acc_s = acc_s + xb[:, sl]
        acc_q = acc_q + xb2[:, sl]
    sum_acc[...] = acc_s
    sumsq_acc[...] = acc_q

    @pl.when((ni == pl.num_programs(1) - 1) & (mi == pl.num_programs(2) - 1))
    def _finalize():
        total = jnp.sum(sum_acc[...], axis=1, keepdims=True)      # one XLU reduce
        total_sq = jnp.sum(sumsq_acc[...], axis=1, keepdims=True)
        mean = total * inv_count
        var = jnp.maximum(total_sq * inv_count - mean * mean, 0.0)
        inv_std = jax.lax.rsqrt(var + EPS)
        scale = gamma_ref[...] * inv_std
        scale_ref[...] = scale
        shift_ref[...] = beta_ref[...] - mean * scale
        new_mm_ref[...] = MOMENTUM * mm_ref[...] + (1.0 - MOMENTUM) * mean
        new_mv_ref[...] = MOMENTUM * mv_ref[...] + (1.0 - MOMENTUM) * var


def _normalize_kernel(x_ref, scale_ref, shift_ref, y_ref):
    """Two-pass fallback, pass 2: y = x * scale + shift (one FMA per element)."""
    x = x_ref[...].astype(jnp.float32)                 # (n_tile, c_tile, hw_tile)
    scale = scale_ref[...][None, :, :]                 # (1, c_tile, 1)
    shift = shift_ref[...][None, :, :]
    y_ref[...] = (x * scale + shift).astype(y_ref.dtype)


# --------------------------------------------------------------------------- #
# Tiling helpers                                                              #
# --------------------------------------------------------------------------- #
def _pick_c_tile(c, max_tile):
    """Largest tile <= max_tile that is a multiple of 8 and divides c, else c."""
    if c <= max_tile:
        return c
    t = (max_tile // 8) * 8
    while t >= 8:
        if c % t == 0:
            return t
        t -= 8
    return c


def _c_tile_candidates(c):
    """Multiples of 8 dividing c (descending); the full dim if none exist."""
    cands = [t for t in range(8, c + 1, 8) if c % t == 0]
    if not cands:
        cands = [c]
    return sorted(set(cands), reverse=True)


def _pick_hw_tile(hw_pad, max_tile):
    """Largest multiple of 128 that divides hw_pad and is <= max_tile.

    hw_pad is always a multiple of 128 (padded in the wrapper), so 128 works as
    a guaranteed floor — no full-dim fallback that could blow VMEM.
    """
    if hw_pad <= max_tile:
        return hw_pad
    t = (max_tile // 128) * 128
    while t >= 128:
        if hw_pad % t == 0:
            return t
        t -= 128
    return 128


def _pick_n_tile(n, max_tile):
    t = min(n, max(1, max_tile))
    while t > 1 and n % t != 0:
        t -= 1
    return max(t, 1)


# --------------------------------------------------------------------------- #
# Wrapper                                                                     #
# --------------------------------------------------------------------------- #
def batch_norm_2d(x_nchw, gamma, beta, moving_mean, moving_var, *,
                  vmem_budget=FUSED_VMEM_BUDGET,
                  target_block_bytes=TARGET_BLOCK_BYTES):
    """Training-mode BatchNorm forward.

    x_nchw: (N, C, H, W). gamma/beta/moving_*: (1, C, 1, 1).
    Returns (Y in NCHW, new moving_mean (1,C,1,1), new moving_var (1,C,1,1)).
    """
    n, c, h, w = x_nchw.shape
    hw = h * w
    hw_pad = ((hw + 127) // 128) * 128
    itemsize = jnp.dtype(x_nchw.dtype).itemsize

    # Free, contiguous reshape (no HBM transpose of X); pad HW lanes to 128.
    x3 = x_nchw.reshape(n, c, hw)
    if hw_pad != hw:
        # Zero pad is exact for the stats (sums are divided by the true count).
        x3 = jnp.pad(x3, ((0, 0), (0, 0), (0, hw_pad - hw)))

    gamma2 = gamma.reshape(c, 1).astype(jnp.float32)
    beta2 = beta.reshape(c, 1).astype(jnp.float32)
    mm2 = moving_mean.reshape(c, 1).astype(jnp.float32)
    mv2 = moving_var.reshape(c, 1).astype(jnp.float32)

    inv_count = 1.0 / float(n * hw)

    # ---- Try the fused single-pass path -------------------------------------
    # Per-step working set: 2x double-buffered X slab + 2x double-buffered Y slab
    # + one f32 working copy of the slab inside the kernel.
    def _fused_step_bytes(ct):
        return n * ct * hw_pad * (4 * itemsize + 4)

    cands = _c_tile_candidates(c)
    preferred_cap = max(8, c // 2)     # >= 2 channel tiles when possible (v7x 2 TCs)
    fused_ct = None
    for ct in cands:
        if ct <= preferred_cap and _fused_step_bytes(ct) <= vmem_budget:
            fused_ct = ct
            break
    if fused_ct is None:
        for ct in cands:
            if _fused_step_bytes(ct) <= vmem_budget:
                fused_ct = ct
                break

    if fused_ct is not None:
        grid = (c // fused_ct,)
        x_spec = pl.BlockSpec((n, fused_ct, hw_pad), lambda ci: (0, ci, 0))
        par_spec = pl.BlockSpec((fused_ct, 1), lambda ci: (ci, 0))
        cost = pl.CostEstimate(
            flops=int(5 * n * c * hw_pad),
            transcendentals=int(c),
            bytes_accessed=int(2 * n * c * hw_pad * itemsize))

        y3, new_mm, new_mv = pl.pallas_call(
            functools.partial(_fused_kernel, inv_count=inv_count),
            out_shape=(
                jax.ShapeDtypeStruct((n, c, hw_pad), x_nchw.dtype),
                jax.ShapeDtypeStruct((c, 1), jnp.float32),
                jax.ShapeDtypeStruct((c, 1), jnp.float32),
            ),
            grid_spec=pltpu.PrefetchScalarGridSpec(
                num_scalar_prefetch=0,
                grid=grid,
                in_specs=[x_spec, par_spec, par_spec, par_spec, par_spec],
                out_specs=(x_spec, par_spec, par_spec),
            ),
            compiler_params=pltpu.CompilerParams(
                dimension_semantics=("parallel",),
                vmem_limit_bytes=VMEM_LIMIT_BYTES),
            cost_estimate=cost,
        )(x3, gamma2, beta2, mm2, mv2)

    else:
        # ---- Two-pass fallback -----------------------------------------------
        c_tile = _pick_c_tile(c, min(128, max(8, c // 2)))
        hw_cap = max(128, target_block_bytes // max(1, c_tile * itemsize))
        hw_tile = _pick_hw_tile(hw_pad, min(hw_cap, 8192))
        n_cap = max(1, target_block_bytes // max(1, c_tile * hw_tile * itemsize))
        n_tile = _pick_n_tile(n, n_cap)
        grid = (c // c_tile, n // n_tile, hw_pad // hw_tile)

        x_spec = pl.BlockSpec((n_tile, c_tile, hw_tile),
                              lambda ci, ni, mi: (ni, ci, mi))
        par_spec = pl.BlockSpec((c_tile, 1), lambda ci, ni, mi: (ci, 0))

        stats_cost = pl.CostEstimate(
            flops=int(3 * n * c * hw_pad),
            transcendentals=int(c),
            bytes_accessed=int(n * c * hw_pad * itemsize))

        scale, shift, new_mm, new_mv = pl.pallas_call(
            functools.partial(_stats_kernel, inv_count=inv_count),
            out_shape=(
                jax.ShapeDtypeStruct((c, 1), jnp.float32),   # scale
                jax.ShapeDtypeStruct((c, 1), jnp.float32),   # shift
                jax.ShapeDtypeStruct((c, 1), jnp.float32),   # new moving_mean
                jax.ShapeDtypeStruct((c, 1), jnp.float32),   # new moving_var
            ),
            grid_spec=pltpu.PrefetchScalarGridSpec(
                num_scalar_prefetch=0,
                grid=grid,
                in_specs=[x_spec, par_spec, par_spec, par_spec, par_spec],
                out_specs=(par_spec, par_spec, par_spec, par_spec),
                scratch_shapes=[pltpu.VMEM((c_tile, 128), jnp.float32),
                                pltpu.VMEM((c_tile, 128), jnp.float32)],
            ),
            compiler_params=pltpu.CompilerParams(
                dimension_semantics=("parallel", "arbitrary", "arbitrary"),
                vmem_limit_bytes=VMEM_LIMIT_BYTES),
            cost_estimate=stats_cost,
        )(x3, gamma2, beta2, mm2, mv2)

        norm_cost = pl.CostEstimate(
            flops=int(2 * n * c * hw_pad),
            transcendentals=0,
            bytes_accessed=int(2 * n * c * hw_pad * itemsize))

        # NOTE: f32 compute path kept for all generations (v5e has no bf16 VPU).
        y3 = pl.pallas_call(
            _normalize_kernel,
            out_shape=jax.ShapeDtypeStruct((n, c, hw_pad), x_nchw.dtype),
            grid_spec=pltpu.PrefetchScalarGridSpec(
                num_scalar_prefetch=0,
                grid=grid,
                in_specs=[x_spec, par_spec, par_spec],
                out_specs=x_spec,
            ),
            compiler_params=pltpu.CompilerParams(
                dimension_semantics=("parallel", "parallel", "parallel"),
                vmem_limit_bytes=VMEM_LIMIT_BYTES),
            cost_estimate=norm_cost,
        )(x3, scale, shift)

    if hw_pad != hw:
        y3 = y3[:, :, :hw]
    y = y3.reshape(n, c, h, w)
    return y, new_mm.reshape(1, c, 1, 1), new_mv.reshape(1, c, 1, 1)


# --------------------------------------------------------------------------- #
# Reference + test                                                            #
# --------------------------------------------------------------------------- #
def _reference(x, gamma, beta, mm, mv):
    xf = x.astype(jnp.float32)
    mean = jnp.mean(xf, axis=(0, 2, 3), keepdims=True)
    var = jnp.mean((xf - mean) ** 2, axis=(0, 2, 3), keepdims=True)
    x_hat = (xf - mean) / jnp.sqrt(var + EPS)
    y = gamma * x_hat + beta
    new_mm = MOMENTUM * mm + (1.0 - MOMENTUM) * mean
    new_mv = MOMENTUM * mv + (1.0 - MOMENTUM) * var
    return y.astype(x.dtype), new_mm, new_mv


if __name__ == "__main__":
    key = jax.random.PRNGKey(0)

    def run_case(shape, case_id, **kw):
        n, c, h, w = shape
        x = jax.random.uniform(jax.random.fold_in(key, case_id), shape,
                               dtype=jnp.float32)
        gamma = jnp.ones((1, c, 1, 1), jnp.float32)
        beta = jnp.zeros((1, c, 1, 1), jnp.float32)
        mm = jnp.zeros((1, c, 1, 1), jnp.float32)
        mv = jnp.ones((1, c, 1, 1), jnp.float32)

        fn = jax.jit(functools.partial(batch_norm_2d, **kw))
        y, new_mm, new_mv = fn(x, gamma, beta, mm, mv)
        jax.block_until_ready((y, new_mm, new_mv))

        y_r, mm_r, mv_r = _reference(x, gamma, beta, mm, mv)
        assert jnp.allclose(y, y_r, atol=1e-4, rtol=1e-4), shape
        assert jnp.allclose(new_mm, mm_r, atol=1e-5, rtol=1e-5), shape
        assert jnp.allclose(new_mv, mv_r, atol=1e-5, rtol=1e-5), shape

    # Fused single-pass path (channel slab fits VMEM).
    run_case((2, 4, 16, 16), 0)
    # Fused path with non-128-multiple HW (padded) and C not a multiple of 8.
    run_case((2, 6, 13, 13), 1)
    # Two-pass fallback with a multi-step reduction grid (forced via tiny budgets).
    run_case((2, 8, 32, 32), 2, vmem_budget=0, target_block_bytes=8 * 1024)
    run_case((2, 6, 13, 13), 3, vmem_budget=0, target_block_bytes=8 * 1024)

    print("KERNEL_OK")
</pallas_src>

<mosaic_0001>
module attributes {stable_mosaic.version = 11 : i64} {
  func.func @_fused_kernel(%arg0: i32, %arg1: memref<2x4x256xf32, #tpu.memory_space<vmem>>, %arg2: memref<4x1xf32, #tpu.memory_space<vmem>>, %arg3: memref<4x1xf32, #tpu.memory_space<vmem>>, %arg4: memref<4x1xf32, #tpu.memory_space<vmem>>, %arg5: memref<4x1xf32, #tpu.memory_space<vmem>>, %arg6: memref<2x4x256xf32, #tpu.memory_space<vmem>>, %arg7: memref<4x1xf32, #tpu.memory_space<vmem>>, %arg8: memref<4x1xf32, #tpu.memory_space<vmem>>) attributes {dimension_semantics = [#tpu.dimension_semantics<parallel>], iteration_bounds = array<i64: 1>, scalar_prefetch = 0 : i64, scratch_operands = 0 : i64, tpu.core_type = #tpu.core_type<tc>, window_params = [{transform_indices = @transform_0, window_bounds = array<i64: 2, 4, 256>}, {transform_indices = @transform_1, window_bounds = array<i64: 4, 1>}, {transform_indices = @transform_2, window_bounds = array<i64: 4, 1>}, {transform_indices = @transform_3, window_bounds = array<i64: 4, 1>}, {transform_indices = @transform_4, window_bounds = array<i64: 4, 1>}, {transform_indices = @transform_5, window_bounds = array<i64: 2, 4, 256>}, {transform_indices = @transform_6, window_bounds = array<i64: 4, 1>}, {transform_indices = @transform_7, window_bounds = array<i64: 4, 1>}]} {
    %c0 = arith.constant 0 : index
    %c0_0 = arith.constant 0 : index
    %c0_1 = arith.constant 0 : index
    %0 = vector.load %arg1[%c0, %c0_0, %c0_1] : memref<2x4x256xf32, #tpu.memory_space<vmem>>, vector<2x4x256xf32>
    %cst = arith.constant dense<0.000000e+00> : vector<4x256xf32>
    %1 = vector.multi_reduction <add>, %0, %cst [0] : vector<2x4x256xf32> to vector<4x256xf32>
    %2 = arith.mulf %0, %0 : vector<2x4x256xf32>
    %cst_2 = arith.constant dense<0.000000e+00> : vector<4x256xf32>
    %3 = vector.multi_reduction <add>, %2, %cst_2 [0] : vector<2x4x256xf32> to vector<4x256xf32>
    %cst_3 = arith.constant dense<0.000000e+00> : vector<4xf32>
    %4 = vector.multi_reduction <add>, %1, %cst_3 [1] : vector<4x256xf32> to vector<4xf32>
    %5 = vector.shape_cast %4 : vector<4xf32> to vector<4x1xf32>
    %cst_4 = arith.constant dense<0.000000e+00> : vector<4xf32>
    %6 = vector.multi_reduction <add>, %3, %cst_4 [1] : vector<4x256xf32> to vector<4xf32>
    %7 = vector.shape_cast %6 : vector<4xf32> to vector<4x1xf32>
    %cst_5 = arith.constant 0.001953125 : f32
    %8 = vector.broadcast %cst_5 : f32 to vector<4x1xf32>
    %9 = arith.mulf %5, %8 : vector<4x1xf32>
    %cst_6 = arith.constant 0.001953125 : f32
    %10 = vector.broadcast %cst_6 : f32 to vector<4x1xf32>
    %11 = arith.mulf %7, %10 : vector<4x1xf32>
    %12 = arith.mulf %9, %9 : vector<4x1xf32>
    %13 = arith.subf %11, %12 : vector<4x1xf32>
    %cst_7 = arith.constant 0.000000e+00 : f32
    %14 = vector.broadcast %cst_7 : f32 to vector<4x1xf32>
    %15 = arith.maximumf %13, %14 : vector<4x1xf32>
    %cst_8 = arith.constant 9.99999974E-6 : f32
    %16 = vector.broadcast %cst_8 : f32 to vector<4x1xf32>
    %17 = arith.addf %15, %16 : vector<4x1xf32>
    %18 = math.rsqrt %17 : vector<4x1xf32>
    %c0_9 = arith.constant 0 : index
    %c0_10 = arith.constant 0 : index
    %19 = vector.load %arg2[%c0_9, %c0_10] : memref<4x1xf32, #tpu.memory_space<vmem>>, vector<4x1xf32>
    %20 = arith.mulf %19, %18 : vector<4x1xf32>
    %c0_11 = arith.constant 0 : index
    %c0_12 = arith.constant 0 : index
    %21 = vector.load %arg3[%c0_11, %c0_12] : memref<4x1xf32, #tpu.memory_space<vmem>>, vector<4x1xf32>
    %22 = arith.mulf %9, %20 : vector<4x1xf32>
    %23 = arith.subf %21, %22 : vector<4x1xf32>
    %24 = vector.shape_cast %20 : vector<4x1xf32> to vector<1x4x1xf32>
    %25 = vector.broadcast %24 : vector<1x4x1xf32> to vector<2x4x256xf32>
    %26 = arith.mulf %0, %25 : vector<2x4x256xf32>
    %27 = vector.shape_cast %23 : vector<4x1xf32> to vector<1x4x1xf32>
    %28 = vector.broadcast %27 : vector<1x4x1xf32> to vector<2x4x256xf32>
    %29 = arith.addf %26, %28 : vector<2x4x256xf32>
    %c0_13 = arith.constant 0 : index
    %c0_14 = arith.constant 0 : index
    %c0_15 = arith.constant 0 : index
    %30 = vector.load %arg6[%c0_13, %c0_14, %c0_15] : memref<2x4x256xf32, #tpu.memory_space<vmem>>, vector<2x4x256xf32>
    tpu.vector_store %arg6[%c0_13, %c0_14, %c0_15], %29 {strides = array<i32>} : memref<2x4x256xf32, #tpu.memory_space<vmem>>, vector<2x4x256xf32>,
    %c0_16 = arith.constant 0 : index
    %c0_17 = arith.constant 0 : index
    %31 = vector.load %arg4[%c0_16, %c0_17] : memref<4x1xf32, #tpu.memory_space<vmem>>, vector<4x1xf32>
    %cst_18 = arith.constant 0.899999976 : f32
    %32 = vector.broadcast %cst_18 : f32 to vector<4x1xf32>
    %33 = arith.mulf %32, %31 : vector<4x1xf32>
    %cst_19 = arith.constant 1.000000e-01 : f32
    %34 = vector.broadcast %cst_19 : f32 to vector<4x1xf32>
    %35 = arith.mulf %34, %9 : vector<4x1xf32>
    %36 = arith.addf %33, %35 : vector<4x1xf32>
    %c0_20 = arith.constant 0 : index
    %c0_21 = arith.constant 0 : index
    %37 = vector.load %arg7[%c0_20, %c0_21] : memref<4x1xf32, #tpu.memory_space<vmem>>, vector<4x1xf32>
    tpu.vector_store %arg7[%c0_20, %c0_21], %36 {strides = array<i32>} : memref<4x1xf32, #tpu.memory_space<vmem>>, vector<4x1xf32>,
    %c0_22 = arith.constant 0 : index
    %c0_23 = arith.constant 0 : index
    %38 = vector.load %arg5[%c0_22, %c0_23] : memref<4x1xf32, #tpu.memory_space<vmem>>, vector<4x1xf32>
    %cst_24 = arith.constant 0.899999976 : f32
    %39 = vector.broadcast %cst_24 : f32 to vector<4x1xf32>
    %40 = arith.mulf %39, %38 : vector<4x1xf32>
    %cst_25 = arith.constant 1.000000e-01 : f32
    %41 = vector.broadcast %cst_25 : f32 to vector<4x1xf32>
    %42 = arith.mulf %41, %15 : vector<4x1xf32>
    %43 = arith.addf %40, %42 : vector<4x1xf32>
    %c0_26 = arith.constant 0 : index
    %c0_27 = arith.constant 0 : index
    %44 = vector.load %arg8[%c0_26, %c0_27] : memref<4x1xf32, #tpu.memory_space<vmem>>, vector<4x1xf32>
    tpu.vector_store %arg8[%c0_26, %c0_27], %43 {strides = array<i32>} : memref<4x1xf32, #tpu.memory_space<vmem>>, vector<4x1xf32>,
    return
  }
  func.func @transform_0(%arg0: i32) -> (i32, i32, i32) {
    %c0_i32 = arith.constant 0 : i32
    %c0_i32_0 = arith.constant 0 : i32
    %c0_i32_1 = arith.constant 0 : i32
    return %c0_i32, %arg0, %c0_i32_0 : i32, i32, i32
  }
  func.func @transform_1(%arg0: i32) -> (i32, i32) {
    %c0_i32 = arith.constant 0 : i32
    %c0_i32_0 = arith.constant 0 : i32
    return %arg0, %c0_i32 : i32, i32
  }
  func.func @transform_2(%arg0: i32) -> (i32, i32) {
    %c0_i32 = arith.constant 0 : i32
    %c0_i32_0 = arith.constant 0 : i32
    return %arg0, %c0_i32 : i32, i32
  }
  func.func @transform_3(%arg0: i32) -> (i32, i32) {
    %c0_i32 = arith.constant 0 : i32
    %c0_i32_0 = arith.constant 0 : i32
    return %arg0, %c0_i32 : i32, i32
  }
  func.func @transform_4(%arg0: i32) -> (i32, i32) {
    %c0_i32 = arith.constant 0 : i32
    %c0_i32_0 = arith.constant 0 : i32
    return %arg0, %c0_i32 : i32, i32
  }
  func.func @transform_5(%arg0: i32) -> (i32, i32, i32) {
    %c0_i32 = arith.constant 0 : i32
    %c0_i32_0 = arith.constant 0 : i32
    %c0_i32_1 = arith.constant 0 : i32
    return %c0_i32, %arg0, %c0_i32_0 : i32, i32, i32
  }
  func.func @transform_6(%arg0: i32) -> (i32, i32) {
    %c0_i32 = arith.constant 0 : i32
    %c0_i32_0 = arith.constant 0 : i32
    return %arg0, %c0_i32 : i32, i32
  }
  func.func @transform_7(%arg0: i32) -> (i32, i32) {
    %c0_i32 = arith.constant 0 : i32
    %c0_i32_0 = arith.constant 0 : i32
    return %arg0, %c0_i32 : i32, i32
  }
}

</mosaic_0001>

<bundles_post_ra>
// kernel: batch_norm_2d.1
= control target key start
LH: loop header
LB: loop body
LE: loop exit
PB: predicated region body
PF: predicated region fallthrough
CT: control target
= control target key end

     0   :  { %vm38_vm0 = vcmask 1043456   ;;  %v150_v30 = vmov 0   ;;  %vm125_vm1 = vcmask 3072   ;;  %v151_v59 = vmov 839922192   ;;  %s248_s0 = inlined_call_operand.vmem [shape: f32[2,4,256], index: 0, kind: input, shape index: {}]   ;;  %s249_s3 = inlined_call_operand.vmem [shape: f32[4,1], index: 3, kind: input, shape index: {}]   ;;  %s250_s6 = inlined_call_operand.vmem [shape: f32[4,1], index: 6, kind: output, shape index: {1}]   ;;  %s251_s4 = inlined_call_operand.vmem [shape: f32[4,1], index: 4, kind: input, shape index: {}]   ;;  %s252_s7 = inlined_call_operand.vmem [shape: f32[4,1], index: 7, kind: output, shape index: {2}]   ;;  %s253_s1 = inlined_call_operand.vmem [shape: f32[4,1], index: 1, kind: input, shape index: {}]   ;;  %s254_s2 = inlined_call_operand.vmem [shape: f32[4,1], index: 2, kind: input, shape index: {}]   ;;  %s255_s5 = inlined_call_operand.vmem [shape: f32[2,4,256], index: 5, kind: output, shape index: {0}]  }
   0x1   :  { %v195_v0 = vld [vmem:[%s248_s0] sm:$0xff]  ;;  %v200_v1 = vld [vmem:[%s248_s0 + $0x8] sm:$0xff]  ;;  %146 = vset.pattern.permute.xlu1 %v150_v30  ;;  %147 = vset.pattern.permute.xlu0 %v150_v30  ;;  %v102_v60 = vunpack.c.l.s4 %v151_v59 }
   0x2   :  { %27 = vst [vmem:[#allocation1] ss:$2 sm:$0xff] %v195_v0  ;;  %v45_v2 = vmul.f32 %v195_v0, %v195_v0  ;;  %v46_v3 = vmul.f32 %v200_v1, %v200_v1  ;;  %v121_v31 = vld [vmem:[%s249_s3] sm:$0xf] }
   0x3   :  { %31 = vst [vmem:[#allocation1 + $0x10] ss:$2 sm:$0xff] %v200_v1  ;;  %v122_v33 = vmul.f32 0.9, %v121_v31  ;;  %v127_v40 = vld [vmem:[%s251_s4] sm:$0xf]  ;;  %v103_v62 = vunpack.c.0.s8 %v102_v60 }
   0x4   :  { %v128_v42 = vmul.f32 0.9, %v127_v40  ;;  %v92_v53 = vld [vmem:[%s253_s1] sm:$0xf] }
   0x5   :  { %v94_v57 = vld [vmem:[%s254_s2] sm:$0xf] }
   0x9   :  { %v28_v4 = vld.sshfl [vmem:[#allocation1] sm:$0xff pattern:$0x75316420]  ;;  %v29_v5 = vld.sshfl [vmem:[#allocation1 + $0x8] sm:$0xff pattern:$0x75316420] }
   0xa   :  { %v32_v6 = vld.sshfl [vmem:[#allocation1 + $0x10] sm:$0xff pattern:$0x75316420]  ;;  %v33_v7 = vld.sshfl [vmem:[#allocation1 + $0x18] sm:$0xff pattern:$0x75316420] }
   0xb   :  { %v39_v8 = vsel %vm38_vm0, %v28_v4, 0.0  ;;  %v40_v9 = vsel %vm38_vm0, %v32_v6, 0.0  ;;  %v42_v10 = vsel %vm38_vm0, %v29_v5, 0.0  ;;  %v43_v11 = vsel %vm38_vm0, %v33_v7, 0.0  ;;  %49 = vst [vmem:[#allocation1] ss:$2 sm:$0xff] %v45_v2 }
   0xc   :  { %v41_v12 = vadd.f32 %v40_v9, %v39_v8  ;;  %v44_v13 = vadd.f32 %v43_v11, %v42_v10  ;;  %53 = vst [vmem:[#allocation1 + $0x10] ss:$2 sm:$0xff] %v46_v3 }
   0xe   :  { %v66_v14 = vsel %vm38_vm0, %v41_v12, 0.0  ;;  %v67_v15 = vsel %vm38_vm0, %v44_v13, 0.0 }
   0xf   :  { %v68_v16 = vadd.f32 %v67_v15, %v66_v14 }
  0x11   :  { %69 = vadd.xlane.f32.xlu0 %v68_v16 }
  0x12   :  { %v50_v17 = vld.sshfl [vmem:[#allocation1] sm:$0xff pattern:$0x75316420]  ;;  %v51_v18 = vld.sshfl [vmem:[#allocation1 + $0x8] sm:$0xff pattern:$0x75316420] }
  0x13   :  { %v54_v19 = vld.sshfl [vmem:[#allocation1 + $0x10] sm:$0xff pattern:$0x75316420]  ;;  %v55_v20 = vld.sshfl [vmem:[#allocation1 + $0x18] sm:$0xff pattern:$0x75316420] }
  0x14   :  { %v60_v21 = vsel %vm38_vm0, %v50_v17, 0.0  ;;  %v61_v22 = vsel %vm38_vm0, %v54_v19, 0.0  ;;  %v63_v23 = vsel %vm38_vm0, %v51_v18, 0.0  ;;  %v64_v24 = vsel %vm38_vm0, %v55_v20, 0.0 }
  0x15   :  { %v62_v25 = vadd.f32 %v61_v22, %v60_v21  ;;  %v65_v26 = vadd.f32 %v64_v24, %v63_v23 }
  0x17   :  { %v71_v27 = vsel %vm38_vm0, %v62_v25, 0.0  ;;  %v72_v28 = vsel %vm38_vm0, %v65_v26, 0.0 }
  0x18   :  { %v73_v29 = vadd.f32 %v72_v28, %v71_v27 }
  0x1a   :  { %74 = vadd.xlane.f32.xlu0 %v73_v29 }
  0x84   :  { %v70_v32 = vpop.xlane.xlu0 %69 }
  0x85   :  { %v76_v34 = vmul.f32 0.001953125, %v70_v32 }
  0x87   :  { %v123_v35 = vmul.f32 0.1, %v76_v34  ;;  %v78_v38 = vmul.f32 %v76_v34, %v76_v34 }
  0x89   :  { %v124_v36 = vadd.f32 %v123_v35, %v122_v33 }
  0x8b   :  { %126 = vst.msk [vmem:[%s250_s6] sm:$0xf] %vm125_vm1, %v124_v36 }
  0x8d   :  { %v75_v37 = vpop.xlane.xlu0 %74 }
  0x8e   :  { %v77_v39 = vmul.f32 0.001953125, %v75_v37 }
  0x90   :  { %v79_v41 = vsub.f32 %v77_v39, %v78_v38 }
  0x92   :  { %v80_v43 = vmax.f32 %v79_v41, 0.0 }
  0x94   :  { %v81_v44 = vadd.f32 1e-05, %v80_v43  ;;  %v129_v45 = vmul.f32 0.1, %v80_v43 }
  0x96   :  { %148 = vrsqrt.f32 %v81_v44  ;;  %v130_v46 = vadd.f32 %v129_v45, %v128_v42  ;;  %vm88_vm3 = vweird.f32 %v81_v44 }
  0x98   :  { %131 = vst.msk [vmem:[%s252_s7] sm:$0xf] %vm125_vm1, %v130_v46 }
  0x9c   :  { %v149_v47 = vpop.eup %148 }
  0x9d   :  { %v83_v48 = vmul.f32 %v149_v47, %v81_v44  ;;  %vm89_vm2 = vweird.f32 %v149_v47 }
  0x9e   :  { %vm90_vm4 = vmor %vm88_vm3, %vm89_vm2 }
  0x9f   :  { %v84_v49 = vmul.f32 %v149_v47, %v83_v48 }
  0xa1   :  { %v85_v50 = vmul.f32 0.5, %v84_v49 }
  0xa3   :  { %v86_v51 = vsub.f32 1.5, %v85_v50 }
  0xa5   :  { %v87_v52 = vmul.f32 %v149_v47, %v86_v51 }
  0xa7   :  { %v91_v54 = vsel %vm90_vm4, %v149_v47, %v87_v52 }
  0xa8   :  { %v93_v55 = vmul.f32 %v92_v53, %v91_v54 }
  0xaa   :  { %99 = vperm.xlu1 %146, %v93_v55   ;;  %v95_v56 = vmul.f32 %v93_v55, %v76_v34 }
  0xac   :  { %v96_v58 = vsub.f32 %v94_v57, %v95_v56 }
  0xb2   :  { %110 = vperm.xlu1 %146, %v96_v58  }
 0x11c   :  { %v100_v61 = vpop.permute.xlu1 %99 }
 0x11d   :  { %v104_v63 = vperm.slane %v100_v61, %v103_v62 }
 0x11f   :  { %v106_v3 = vmul.f32 %v104_v63, %v195_v0  ;;  %v107_v4 = vmul.f32 %v104_v63, %v200_v1 }
 0x124   :  { %v111_v2 = vpop.permute.xlu1 %110 }
 0x125   :  { %v115_v5 = vperm.slane %v111_v2, %v103_v62 }
 0x127   :  { %v117_v6 = vadd.f32 %v115_v5, %v106_v3  ;;  %v118_v7 = vadd.f32 %v115_v5, %v107_v4 }
 0x129   :  { %119 = vst [vmem:[%s255_s5] sm:$0xff] %v117_v6 }
 0x12a   :  { %120 = vst [vmem:[%s255_s5 + $0x8] sm:$0xff] %v118_v7 }

</bundles_post_ra>
